<compile_context>
chip_gen: v7x
topology: tpu7x:2x2x1
jax: 0.10.0
libtpu: 0.0.40
codegen_flags: <defaults>
</compile_context>

<pallas_src>
import jax
import jax.numpy as jnp
from jax import lax
from jax.experimental import pallas as pl
from jax.experimental.pallas import tpu as pltpu

HIDDEN = 32
MAX_TB = 1024  # cap on the batch tile (lane axis); multiple of 128


def _batch_tiling(batch):
    """Pick (padded_batch, batch_tile).

    Tiles are multiples of 128 (lane-dense stores), capped at MAX_TB, and we
    keep >= 2 grid steps whenever the batch allows so the "parallel" grid axis
    shards across both TensorCores on v7x.
    """
    padded = pl.cdiv(batch, 128) * 128
    if padded <= 128:
        return padded, padded
    tb = min(MAX_TB, (padded // 2) // 128 * 128)
    tb = max(tb, 128)
    padded = pl.cdiv(padded, tb) * tb
    return padded, tb


def dqn_kernel(x_ref, w1_ref, w2_ref, w3_ref, w4_ref, bias_ref, o_ref):
    """One batch tile: x_ref (TB, in) bf16 -> o_ref (out, TB) f32 (feature-major)."""
    out_size = o_ref.shape[0]
    b1 = bias_ref[:, 0:1]                 # (HIDDEN, 1) f32, broadcast along lanes
    b2 = bias_ref[:, 1:2]
    b3 = bias_ref[:, 2:3]
    b4 = bias_ref[:out_size, 3:4]         # (out_size, 1) f32

    # Layer 1: contract the feature axis of W1 (out, in) with the feature axis
    # of the batch-major x tile (TB, in) -> (HIDDEN, TB) feature-major
    # activations. The tiny (TB, in) transpose happens inside the kernel on
    # the XLU, which is otherwise idle here.
    h = lax.dot_general(
        w1_ref[...], x_ref[...],
        dimension_numbers=(((1,), (1,)), ((), ())),
        preferred_element_type=jnp.float32)
    h = jnp.maximum(h + b1, 0.0)
    # Layer 2: Linear + ReLU
    h = jnp.dot(w2_ref[...], h.astype(jnp.bfloat16),
                preferred_element_type=jnp.float32)
    h = jnp.maximum(h + b2, 0.0)
    # Layer 3: Linear + ReLU
    h = jnp.dot(w3_ref[...], h.astype(jnp.bfloat16),
                preferred_element_type=jnp.float32)
    h = jnp.maximum(h + b3, 0.0)
    # Layer 4: Linear (no activation)
    out = jnp.dot(w4_ref[...], h.astype(jnp.bfloat16),
                  preferred_element_type=jnp.float32)
    o_ref[...] = (out + b4).astype(o_ref.dtype)


def pack_params(params):
    """One-time repack (outside the per-call path): bf16 weights in PyTorch
    (out, in) layout + a packed (HIDDEN, 4) f32 bias column table."""
    (w1, b1), (w2, b2), (w3, b3), (w4, b4) = params
    out_size = w4.shape[0]
    bias_pack = jnp.zeros((HIDDEN, 4), jnp.float32)
    bias_pack = bias_pack.at[:, 0].set(b1)
    bias_pack = bias_pack.at[:, 1].set(b2)
    bias_pack = bias_pack.at[:, 2].set(b3)
    bias_pack = bias_pack.at[:out_size, 3].set(b4)
    w1b, w2b, w3b, w4b = (w.astype(jnp.bfloat16) for w in (w1, w2, w3, w4))
    return w1b, w2b, w3b, w4b, bias_pack


@jax.jit
def dqn_forward(x, w1b, w2b, w3b, w4b, bias_pack):
    """x: (batch, input_size) f32. Weights pre-cast to bf16 by pack_params."""
    batch, input_size = x.shape
    out_size = w4b.shape[0]

    padded, tb = _batch_tiling(batch)
    n_tiles = padded // tb
    # Zero-pad the batch axis: padded rows flow through W@0 + b + ReLU
    # harmlessly and are sliced off below. No transpose on the wrapper side.
    xp = x if padded == batch else jnp.pad(x, ((0, padded - batch), (0, 0)))
    xb = xp.astype(jnp.bfloat16)                          # (padded, input_size)

    flops = 2 * padded * (input_size * HIDDEN + 2 * HIDDEN * HIDDEN
                          + HIDDEN * out_size)
    bytes_accessed = (xb.size * 2
                      + (w1b.size + w2b.size + w3b.size + w4b.size) * 2
                      + bias_pack.size * 4
                      + out_size * padded * 4)

    resident = lambda i: (0, 0)   # weights/biases: same block every step -> stay in VMEM
    out_t = pl.pallas_call(
        dqn_kernel,
        out_shape=jax.ShapeDtypeStruct((out_size, padded), jnp.float32),
        grid_spec=pltpu.PrefetchScalarGridSpec(
            num_scalar_prefetch=0,
            grid=(n_tiles,),
            in_specs=[
                # batch-major activations; if profiling ever shows exposed DMA
                # at large TB, add pipeline_mode=pl.Buffered(3) here only.
                pl.BlockSpec((tb, input_size), lambda i: (i, 0)),
                pl.BlockSpec((HIDDEN, input_size), resident),       # W1
                pl.BlockSpec((HIDDEN, HIDDEN), resident),            # W2
                pl.BlockSpec((HIDDEN, HIDDEN), resident),            # W3
                pl.BlockSpec((out_size, HIDDEN), resident),          # W4
                pl.BlockSpec((HIDDEN, 4), resident),                 # packed biases
            ],
            out_specs=pl.BlockSpec((out_size, tb), lambda i: (0, i)),
        ),
        compiler_params=pltpu.CompilerParams(
            dimension_semantics=("parallel",),       # megacore on v7x
            vmem_limit_bytes=16 * 1024 * 1024,       # tiles are O(100 KB); valid on all gens
        ),
        cost_estimate=pl.CostEstimate(flops=flops, transcendentals=0,
                                      bytes_accessed=bytes_accessed),
    )(xb, w1b, w2b, w3b, w4b, bias_pack)

    return out_t[:, :batch].T                           # (batch, out_size)


def init_params(key, input_size, output_size):
    """Deterministic parameter init in PyTorch layout (synthetic; not a checkpoint)."""
    sizes = [(input_size, HIDDEN), (HIDDEN, HIDDEN), (HIDDEN, HIDDEN),
             (HIDDEN, output_size)]
    params = []
    for fan_in, fan_out in sizes:
        key, kw, kb = jax.random.split(key, 3)
        bound = fan_in ** -0.5
        w = jax.random.uniform(kw, (fan_out, fan_in), jnp.float32, -bound, bound)
        b = jax.random.uniform(kb, (fan_out,), jnp.float32, -bound, bound)
        params.append((w, b))
    return params


def dqn_reference_f32(x, params):
    h = x
    for i, (w, b) in enumerate(params):
        h = h @ w.T + b
        if i < len(params) - 1:
            h = jnp.maximum(h, 0.0)
    return h


def dqn_reference_bf16(x, params):
    """Matches kernel numerics: bf16 matmul operands, f32 accumulation, f32 bias/ReLU."""
    h = x
    for i, (w, b) in enumerate(params):
        h = jnp.dot(h.astype(jnp.bfloat16), w.astype(jnp.bfloat16).T,
                    preferred_element_type=jnp.float32) + b
        if i < len(params) - 1:
            h = jnp.maximum(h, 0.0)
    return h


# TODO(synk): self.loss (torch.nn.MSELoss) is training-only and not part of forward().

if __name__ == "__main__":
    # batch=200 is not a multiple of 128 to exercise the padding path;
    # the tiling picks TB=128 with 2 parallel grid steps.
    batch, input_size, output_size = 200, 16, 4
    key = jax.random.PRNGKey(0)
    key, kx = jax.random.split(key)
    x = jax.random.normal(kx, (batch, input_size), jnp.float32)
    params = init_params(key, input_size, output_size)

    packed = pack_params(params)   # one-time: bf16 weights + packed bias table
    out = jax.block_until_ready(dqn_forward(x, *packed))
    assert out.shape == (batch, output_size)

    ref_bf16 = dqn_reference_bf16(x, params)   # same numerics as the kernel
    ref_f32 = dqn_reference_f32(x, params)     # pure-f32 PyTorch-equivalent math
    assert jnp.allclose(out, ref_bf16, atol=1e-3, rtol=1e-3), \
        float(jnp.max(jnp.abs(out - ref_bf16)))
    assert jnp.allclose(out, ref_f32, atol=5e-2, rtol=5e-2), \
        float(jnp.max(jnp.abs(out - ref_f32)))
    print("KERNEL_OK")
</pallas_src>

<mosaic_0001>
module attributes {stable_mosaic.version = 11 : i64} {
  func.func @dqn_kernel(%arg0: i32, %arg1: memref<128x16xbf16, #tpu.memory_space<vmem>>, %arg2: memref<32x16xbf16, #tpu.memory_space<vmem>>, %arg3: memref<32x32xbf16, #tpu.memory_space<vmem>>, %arg4: memref<32x32xbf16, #tpu.memory_space<vmem>>, %arg5: memref<4x32xbf16, #tpu.memory_space<vmem>>, %arg6: memref<32x4xf32, #tpu.memory_space<vmem>>, %arg7: memref<4x128xf32, #tpu.memory_space<vmem>>) attributes {dimension_semantics = [#tpu.dimension_semantics<parallel>], iteration_bounds = array<i64: 2>, scalar_prefetch = 0 : i64, scratch_operands = 0 : i64, tpu.core_type = #tpu.core_type<tc>, window_params = [{transform_indices = @transform_0, window_bounds = array<i64: 128, 16>}, {pipeline_mode = #tpu.pipeline_mode<synchronous>, transform_indices = @transform_1, window_bounds = array<i64: 32, 16>}, {pipeline_mode = #tpu.pipeline_mode<synchronous>, transform_indices = @transform_2, window_bounds = array<i64: 32, 32>}, {pipeline_mode = #tpu.pipeline_mode<synchronous>, transform_indices = @transform_3, window_bounds = array<i64: 32, 32>}, {pipeline_mode = #tpu.pipeline_mode<synchronous>, transform_indices = @transform_4, window_bounds = array<i64: 4, 32>}, {pipeline_mode = #tpu.pipeline_mode<synchronous>, transform_indices = @transform_5, window_bounds = array<i64: 32, 4>}, {transform_indices = @transform_6, window_bounds = array<i64: 4, 128>}]} {
    %c0 = arith.constant 0 : index
    %c0_0 = arith.constant 0 : index
    %0 = vector.load %arg6[%c0, %c0_0] : memref<32x4xf32, #tpu.memory_space<vmem>>, vector<32x1xf32>
    %c0_1 = arith.constant 0 : index
    %c1 = arith.constant 1 : index
    %1 = vector.load %arg6[%c0_1, %c1] : memref<32x4xf32, #tpu.memory_space<vmem>>, vector<32x1xf32>
    %c0_2 = arith.constant 0 : index
    %c2 = arith.constant 2 : index
    %2 = vector.load %arg6[%c0_2, %c2] : memref<32x4xf32, #tpu.memory_space<vmem>>, vector<32x1xf32>
    %c0_3 = arith.constant 0 : index
    %c3 = arith.constant 3 : index
    %3 = vector.load %arg6[%c0_3, %c3] : memref<32x4xf32, #tpu.memory_space<vmem>>, vector<4x1xf32>
    %c0_4 = arith.constant 0 : index
    %c0_5 = arith.constant 0 : index
    %4 = vector.load %arg2[%c0_4, %c0_5] : memref<32x16xbf16, #tpu.memory_space<vmem>>, vector<32x16xbf16>
    %c0_6 = arith.constant 0 : index
    %c0_7 = arith.constant 0 : index
    %5 = vector.load %arg1[%c0_6, %c0_7] : memref<128x16xbf16, #tpu.memory_space<vmem>>, vector<128x16xbf16>
    %cst = arith.constant dense<0.000000e+00> : vector<32x128xf32>
    %6 = tpu.matmul %4, %5, %cst {dimension_numbers = #tpu.dot_dimension_numbers<[1], [1], [0], [0], [0, 0, 1, 0], [], []>} : vector<32x16xbf16>, vector<128x16xbf16>, vector<32x128xf32> -> vector<32x128xf32>
    %7 = vector.broadcast %0 : vector<32x1xf32> to vector<32x128xf32>
    %8 = arith.addf %6, %7 : vector<32x128xf32>
    %cst_8 = arith.constant 0.000000e+00 : f32
    %9 = vector.broadcast %cst_8 : f32 to vector<32x128xf32>
    %10 = arith.maximumf %8, %9 : vector<32x128xf32>
    %c0_9 = arith.constant 0 : index
    %c0_10 = arith.constant 0 : index
    %11 = vector.load %arg3[%c0_9, %c0_10] : memref<32x32xbf16, #tpu.memory_space<vmem>>, vector<32x32xbf16>
    %12 = arith.truncf %10 : vector<32x128xf32> to vector<32x128xbf16>
    %cst_11 = arith.constant dense<0.000000e+00> : vector<32x128xf32>
    %13 = tpu.matmul %11, %12, %cst_11 {dimension_numbers = #tpu.dot_dimension_numbers<[1], [0], [0], [1], [0, 0, 1, 1], [], []>} : vector<32x32xbf16>, vector<32x128xbf16>, vector<32x128xf32> -> vector<32x128xf32>
    %14 = vector.broadcast %1 : vector<32x1xf32> to vector<32x128xf32>
    %15 = arith.addf %13, %14 : vector<32x128xf32>
    %cst_12 = arith.constant 0.000000e+00 : f32
    %16 = vector.broadcast %cst_12 : f32 to vector<32x128xf32>
    %17 = arith.maximumf %15, %16 : vector<32x128xf32>
    %c0_13 = arith.constant 0 : index
    %c0_14 = arith.constant 0 : index
    %18 = vector.load %arg4[%c0_13, %c0_14] : memref<32x32xbf16, #tpu.memory_space<vmem>>, vector<32x32xbf16>
    %19 = arith.truncf %17 : vector<32x128xf32> to vector<32x128xbf16>
    %cst_15 = arith.constant dense<0.000000e+00> : vector<32x128xf32>
    %20 = tpu.matmul %18, %19, %cst_15 {dimension_numbers = #tpu.dot_dimension_numbers<[1], [0], [0], [1], [0, 0, 1, 1], [], []>} : vector<32x32xbf16>, vector<32x128xbf16>, vector<32x128xf32> -> vector<32x128xf32>
    %21 = vector.broadcast %2 : vector<32x1xf32> to vector<32x128xf32>
    %22 = arith.addf %20, %21 : vector<32x128xf32>
    %cst_16 = arith.constant 0.000000e+00 : f32
    %23 = vector.broadcast %cst_16 : f32 to vector<32x128xf32>
    %24 = arith.maximumf %22, %23 : vector<32x128xf32>
    %c0_17 = arith.constant 0 : index
    %c0_18 = arith.constant 0 : index
    %25 = vector.load %arg5[%c0_17, %c0_18] : memref<4x32xbf16, #tpu.memory_space<vmem>>, vector<4x32xbf16>
    %26 = arith.truncf %24 : vector<32x128xf32> to vector<32x128xbf16>
    %cst_19 = arith.constant dense<0.000000e+00> : vector<4x128xf32>
    %27 = tpu.matmul %25, %26, %cst_19 {dimension_numbers = #tpu.dot_dimension_numbers<[1], [0], [0], [1], [0, 0, 1, 1], [], []>} : vector<4x32xbf16>, vector<32x128xbf16>, vector<4x128xf32> -> vector<4x128xf32>
    %28 = vector.broadcast %3 : vector<4x1xf32> to vector<4x128xf32>
    %29 = arith.addf %27, %28 : vector<4x128xf32>
    %c0_20 = arith.constant 0 : index
    %c0_21 = arith.constant 0 : index
    %30 = vector.load %arg7[%c0_20, %c0_21] : memref<4x128xf32, #tpu.memory_space<vmem>>, vector<4x128xf32>
    tpu.vector_store %arg7[%c0_20, %c0_21], %29 {strides = array<i32>} : memref<4x128xf32, #tpu.memory_space<vmem>>, vector<4x128xf32>,
    return
  }
  func.func @transform_0(%arg0: i32) -> (i32, i32) {
    %c0_i32 = arith.constant 0 : i32
    %c0_i32_0 = arith.constant 0 : i32
    return %arg0, %c0_i32 : i32, i32
  }
  func.func @transform_1(%arg0: i32) -> (i32, i32) {
    %c0_i32 = arith.constant 0 : i32
    %c0_i32_0 = arith.constant 0 : i32
    %c0_i32_1 = arith.constant 0 : i32
    return %c0_i32, %c0_i32_0 : i32, i32
  }
  func.func @transform_2(%arg0: i32) -> (i32, i32) {
    %c0_i32 = arith.constant 0 : i32
    %c0_i32_0 = arith.constant 0 : i32
    %c0_i32_1 = arith.constant 0 : i32
    return %c0_i32, %c0_i32_0 : i32, i32
  }
  func.func @transform_3(%arg0: i32) -> (i32, i32) {
    %c0_i32 = arith.constant 0 : i32
    %c0_i32_0 = arith.constant 0 : i32
    %c0_i32_1 = arith.constant 0 : i32
    return %c0_i32, %c0_i32_0 : i32, i32
  }
  func.func @transform_4(%arg0: i32) -> (i32, i32) {
    %c0_i32 = arith.constant 0 : i32
    %c0_i32_0 = arith.constant 0 : i32
    %c0_i32_1 = arith.constant 0 : i32
    return %c0_i32, %c0_i32_0 : i32, i32
  }
  func.func @transform_5(%arg0: i32) -> (i32, i32) {
    %c0_i32 = arith.constant 0 : i32
    %c0_i32_0 = arith.constant 0 : i32
    %c0_i32_1 = arith.constant 0 : i32
    return %c0_i32, %c0_i32_0 : i32, i32
  }
  func.func @transform_6(%arg0: i32) -> (i32, i32) {
    %c0_i32 = arith.constant 0 : i32
    %c0_i32_0 = arith.constant 0 : i32
    return %c0_i32, %arg0 : i32, i32
  }
}

</mosaic_0001>

<bundles_post_ra>
// kernel: dqn_forward.1
= control target key start
LH: loop header
LB: loop body
LE: loop exit
PB: predicated region body
PF: predicated region fallthrough
CT: control target
= control target key end

     0   :  { %s908_s21 = smov 0   ;;  %s1019_s0 = inlined_call_operand.vmem [shape: bf16[256,16], index: 0, kind: input, shape index: {}]   ;;  %s1020_s1 = inlined_call_operand.vmem [shape: bf16[32,16], index: 1, kind: input, shape index: {}]   ;;  %s1021_s2 = inlined_call_operand.vmem [shape: bf16[32,32], index: 2, kind: input, shape index: {}]   ;;  %s1022_s3 = inlined_call_operand.vmem [shape: bf16[32,32], index: 3, kind: input, shape index: {}]   ;;  %s1023_s4 = inlined_call_operand.vmem [shape: bf16[4,32], index: 4, kind: input, shape index: {}]   ;;  %s1024_s5 = inlined_call_operand.vmem [shape: f32[32,4], index: 5, kind: input, shape index: {}]   ;;  %s1025_s6 = inlined_call_operand.vmem [shape: f32[4,256], index: 6, kind: output, shape index: {}]  }
   0x1 LB: > { %s914_s22 = sadd.s32 4294967295, %s865_s21   ;;  %p724_p0 = scmp.ge.s32.totalorder %s865_s21, 1  ;;  %s865_s21 = sphi %s908_s21, %s16_s21  }
   0x2   : > { %p213_p1 = scmp.lt.s32.totalorder %s865_s21, 3 }
   0x4   : > { %p214_p2 = pnand %p724_p0, %p213_p1 }
   0x5   : > { %s725_s23 = sshll.u32 (!%p214_p2), %s914_s22, 4  ;;  %v853_v0 = vld [vmem:[%s1020_s1] sm:$0xff] (!%p214_p2)   ;;  %vm348_vm0 = vcmask (!%p214_p2), 130048   ;;  %v930_v2 = vld [vmem:[%s1024_s5 + $0x10] sm:$0xff] (!%p214_p2)  ;;  %v867_v3 = vmov (!%p214_p2), 0   ;;  %v938_v4 = vld [vmem:[%s1024_s5 + $0x8] sm:$0xff] (!%p214_p2) }
   0x6   : > { %217 = sbr.rel (%p214_p2) target bundleno = 982 (0x3d6), region = 44  ;;  %p243_p3 = scmp.lt.s32.totalorder (!%p214_p2), %s725_s23, 31  ;;  %v925_v1 = vld [vmem:[%s1024_s5] sm:$0xff] (!%p214_p2)  ;;  %788 = vmatprep.mubr.msk.bf16.mxu0 (!%p214_p2), %vm348_vm0, %v853_v0  ;;  %838 = vset.pattern.permute.xlu0 (!%p214_p2), %v867_v3  ;;  %v948_v5 = vld [vmem:[%s1024_s5 + $0x18] sm:$0xff] (!%p214_p2)  ;;  %v854_v22 = vld [vmem:[%s1020_s1 + $0x8] sm:$0xff] (!%p214_p2)   ;;  %vm464_vm1 = vcmask (!%p214_p2), 261120  }
   0x7   : > { %280 = vperm.xlu0 (!%p214_p2), %838, %v925_v1   ;;  %839 = vset.pattern.permute.xlu1 (!%p214_p2), %v867_v3  ;;  %v855_v23 = vld [vmem:[%s1021_s2] sm:$0xff] (!%p214_p2)   ;;  %v868_v24 = vmov (!%p214_p2), 1   ;;  %v856_v43 = vld [vmem:[%s1021_s2 + $0x8] sm:$0xff] (!%p214_p2)   ;;  %v869_v45 = vmov (!%p214_p2), 2   ;;  %vm871_vm2 = vmmov (!%p214_p2), 0   ;;  %v872_v3 = vmov (!%p214_p2), 3  }
   0x8   : > { %290 = vperm.xlu1 (!%p214_p2), %839, %v930_v2   ;;  %796 = vmatprep.mubr.msk.bf16.mxu1 (!%p214_p2), %vm464_vm1, %v855_v23  ;;  %v857_v44 = vld [vmem:[%s1022_s3] sm:$0xff] (!%p214_p2)   ;;  %v858_v0 = vld [vmem:[%s1022_s3 + $0x8] sm:$0xff] (!%p214_p2)   ;;  %p248_p4 = scmp.lt.s32.totalorder (!%p214_p2), %s914_s22, 1 }
   0xb   : > { %285 = vperm.xlu0 (!%p214_p2), %838, %v938_v4  }
   0xc   : > { %295 = vperm.xlu1 (!%p214_p2), %839, %v948_v5  }
   0xd   : > { %s1027_s23 = smov (!%p243_p3, %s725_s23), 31  ;;  %s1029_s22 = smov (!%p248_p4, %s914_s22), 1 }
   0xe   : > { %s726_s30 = sshll.u32 %s1027_s23, 2 }
   0xf   : > { %s943_s11 = scalar_lea.vmem %s1019_s0, %s726_s30  ;;  %840 = vset.pattern.permute.xlu0 %v868_v24  ;;  %s727_s30 = sshll.u32 %s1029_s22, 2 }
  0x10   : > { %v845_v6 = vld [vmem:[%s943_s11] sm:$0xff]   ;;  %v846_v7 = vld [vmem:[%s943_s11 + $0x8] sm:$0xff]   ;;  %v847_v10 = vld [vmem:[%s943_s11 + $0x10] sm:$0xff]   ;;  %841 = vset.pattern.permute.xlu1 %v868_v24  ;;  %439 = vperm.xlu0 %840, %v925_v1   ;;  %s251_s9 = scalar_lea.vmem %s1025_s6, %s727_s30 }
  0x11   : > { %816 = vmatprep.subr.msk.bf16.mxu0 %vm348_vm0, %v845_v6  ;;  %v356_v8 = vsel %vm348_vm0, %v845_v6, 0  ;;  %v359_v9 = vsel %vm348_vm0, %v846_v7, 0  ;;  %v362_v11 = vsel %vm348_vm0, %v847_v10, 0  ;;  %v848_v12 = vld [vmem:[%s943_s11 + $0x18] sm:$0xff]   ;;  %v849_v14 = vld [vmem:[%s943_s11 + $0x20] sm:$0xff]   ;;  %v850_v16 = vld [vmem:[%s943_s11 + $0x28] sm:$0xff]   ;;  %443 = vperm.xlu1 %841, %v938_v4  }
  0x12   : > { %773 = vmatpush3.bf16.xpose.msra.mxu0 %v356_v8  ;;  %v365_v13 = vsel %vm348_vm0, %v848_v12, 0  ;;  %v368_v15 = vsel %vm348_vm0, %v849_v14, 0  ;;  %v371_v17 = vsel %vm348_vm0, %v850_v16, 0  ;;  %v851_v18 = vld [vmem:[%s943_s11 + $0x30] sm:$0xff]   ;;  %v852_v20 = vld [vmem:[%s943_s11 + $0x38] sm:$0xff]  }
  0x13   : > { %817 = vmatprep.subr.msk.bf16.mxu0 %vm348_vm0, %v846_v7  ;;  %v374_v19 = vsel %vm348_vm0, %v851_v18, 0  ;;  %v377_v21 = vsel %vm348_vm0, %v852_v20, 0 }
  0x14   : > { %451 = vperm.xlu0 %840, %v948_v5  }
  0x15   : > { %447 = vperm.xlu1 %841, %v930_v2  }
  0x18   : > { %843 = vset.pattern.permute.xlu0 %v869_v45 }
  0x19   : > { %842 = vset.pattern.permute.xlu1 %v869_v45  ;;  %535 = vperm.xlu0 %843, %v938_v4  }
  0x1a   : > { %775 = vmatpush3.bf16.xpose.msra.mxu0 %v359_v9  ;;  %531 = vperm.xlu1 %842, %v925_v1   ;;  %v870_v1 = vmov 0.0  }
  0x1b   : > { %818 = vmatprep.subr.msk.bf16.mxu0 %vm348_vm0, %v847_v10 }
  0x1d   : > { %844 = vset.pattern.permute.xlu0 %v872_v3 }
  0x1e   : > { %539 = vperm.xlu1 %842, %v930_v2   ;;  %v257_v2 = vld [vmem:[%s1024_s5] sm:$0xf] }
  0x1f   : > { %620 = vperm.xlu0 %844, %v257_v2  }
  0x22   : > { %777 = vmatpush3.bf16.xpose.msra.mxu0 %v362_v11  ;;  %543 = vperm.xlu1 %842, %v948_v5  }
  0x23   : > { %819 = vmatprep.subr.msk.bf16.mxu0 %vm348_vm0, %v848_v12 }
  0x2a   : > { %779 = vmatpush3.bf16.xpose.msra.mxu0 %v365_v13 }
  0x2b   : > { %820 = vmatprep.subr.msk.bf16.mxu0 %vm348_vm0, %v849_v14 }
  0x32   : > { %781 = vmatpush3.bf16.xpose.msra.mxu0 %v368_v15 }
  0x33   : > { %821 = vmatprep.subr.msk.bf16.mxu0 %vm348_vm0, %v850_v16 }
  0x3a   : > { %783 = vmatpush3.bf16.xpose.msra.mxu0 %v371_v17 }
  0x3b   : > { %822 = vmatprep.subr.msk.bf16.mxu0 %vm348_vm0, %v851_v18 }
  0x42   : > { %785 = vmatpush3.bf16.xpose.msra.mxu0 %v374_v19 }
  0x43   : > { %823 = vmatprep.subr.msk.bf16.mxu0 %vm348_vm0, %v852_v20 }
  0x4a   : > { %787 = vmatpush3.bf16.xpose.msra.mxu0 %v377_v21 }
  0x51   : > { %789 = vmatmul.mubr.msk.bf16.vlgmr.msra.gmra.mrb[0].mxu0 %vm348_vm0, %v854_v22  ;;  %v615_v22 = vld [vmem:[%s1023_s4] sm:$0x3] }
  0x86   : > { %v281_v26 = vpop.permute.xlu0 %280 }
  0x87   : > { %v291_v25 = vpop.permute.xlu1 %290 }
  0x8a   : > { %v286_v33 = vpop.permute.xlu0 %285 }
  0x8b   : > { %v296_v28 = vpop.permute.xlu1 %295 }
  0x8f   : > { %v440_v47 = vpop.permute.xlu0 %439 }
  0x90   : > { %v444_v46 = vpop.permute.xlu1 %443 }
  0x93   : > { %v452_v50 = vpop.permute.xlu0 %451 }
  0x94   : > { %v448_v48 = vpop.permute.xlu1 %447 }
  0x98   : > { %v536_v9 = vpop.permute.xlu0 %535 }
  0x99   : > { %v532_v4 = vpop.permute.xlu1 %531 }
  0x9d   : > { %v540_v5 = vpop.permute.xlu1 %539 }
  0x9e   : > { %v621_v23 = vpop.permute.xlu0 %620 }
  0xa1   : > { %v544_v10 = vpop.permute.xlu1 %543 }
 0x124   : > { %v790_v27 = vpop.f32.mrb[0].mxu0 }
 0x125   : > { %v422_v29 = vadd.f32 %v790_v27, %v291_v25  ;;  %v413_v30 = vpop.f32.mrb[1].mxu0 }
 0x126   : > { %v414_v31 = vadd.f32 %v413_v30, %v281_v26  ;;  %v791_v32 = vpop.f32.mrb[2].mxu0 }
 0x127   : > { %v425_v34 = vadd.f32 %v791_v32, %v296_v28  ;;  %v416_v35 = vpop.f32.mrb[3].mxu0  ;;  %v430_v37 = vmax.f32 %v422_v29, 0.0 }
 0x128   : > { %v417_v36 = vadd.f32 %v416_v35, %v286_v33  ;;  %v428_v39 = vmax.f32 %v414_v31, 0.0 }
 0x129   : > { %v431_v38 = vmax.f32 %v425_v34, 0.0 }
 0x12a   : > { %v429_v40 = vmax.f32 %v417_v36, 0.0 }
 0x12b   : > { %v437_v41 = vpack.c.bf16 %v431_v38, %v430_v37 }
 0x12c   : > { %v436_v42 = vpack.c.bf16 %v429_v40, %v428_v39 }
 0x12e   : > { %792 = vmatprep.subr.bf16.mxu1 %v436_v42 }
 0x12f   : > { %793 = vmatpush3.bf16.msra.mxu1 %v436_v42 }
 0x130   : > { %794 = vmatprep.subr.bf16.mxu1 %v437_v41 }
 0x133   : > { %795 = vmatpush3.bf16.msra.mxu1 %v437_v41 }
 0x136   : > { %797 = vmatmul.mubr.msk.bf16.vlgmr.msra.gmra.mrb[0].mxu1 %vm464_vm1, %v856_v43 }
 0x137   : > { %804 = vmatprep.mubr.msk.bf16.mxu1 %vm464_vm1, %v857_v44 }
 0x209   : > { %v798_v49 = vpop.f32.mrb[0].mxu1 }
 0x20a   : > { %v514_v51 = vadd.f32 %v798_v49, %v448_v48  ;;  %v505_v52 = vpop.f32.mrb[1].mxu1 }
 0x20b   : > { %v506_v53 = vadd.f32 %v505_v52, %v440_v47  ;;  %v799_v54 = vpop.f32.mrb[2].mxu1 }
 0x20c   : > { %v517_v55 = vadd.f32 %v799_v54, %v452_v50  ;;  %v508_v56 = vpop.f32.mrb[3].mxu1  ;;  %v522_v58 = vmax.f32 %v514_v51, 0.0 }
 0x20d   : > { %v509_v57 = vadd.f32 %v508_v56, %v444_v46  ;;  %v520_v60 = vmax.f32 %v506_v53, 0.0 }
 0x20e   : > { %v523_v59 = vmax.f32 %v517_v55, 0.0 }
 0x20f   : > { %v521_v61 = vmax.f32 %v509_v57, 0.0 }
 0x210   : > { %v529_v62 = vpack.c.bf16 %v523_v59, %v522_v58 }
 0x211   : > { %v528_v63 = vpack.c.bf16 %v521_v61, %v520_v60 }
 0x213   : > { %800 = vmatprep.subr.bf16.mxu1 %v528_v63 }
 0x214   : > { %801 = vmatpush3.bf16.msra.mxu1 %v528_v63 }
 0x215   : > { %802 = vmatprep.subr.bf16.mxu1 %v529_v62 }
 0x218   : > { %803 = vmatpush3.bf16.msra.mxu1 %v529_v62 }
 0x219   : > { %808 = vmatprep.subr.bf16.mxu1 %v870_v1 }
 0x21b   : > { %805 = vmatmul.mubr.msk.bf16.vlgmr.msra.gmra.mrb[4].mxu1 %vm464_vm1, %v858_v0 }
 0x21c   : > { %812 = vmatprep.mubr.msk.bf16.mxu1 %vm871_vm2, %v870_v1 }
 0x2ee   : > { %v806_v6 = vpop.f32.mrb[4].mxu1 }
 0x2ef   : > { %v605_v7 = vadd.f32 %v806_v6, %v540_v5  ;;  %v596_v8 = vpop.f32.mrb[5].mxu1 }
 0x2f0   : > { %v597_v11 = vadd.f32 %v596_v8, %v532_v4  ;;  %v807_v12 = vpop.f32.mrb[6].mxu1 }
 0x2f1   : > { %v608_v13 = vadd.f32 %v807_v12, %v544_v10  ;;  %v599_v14 = vpop.f32.mrb[7].mxu1  ;;  %v613_v16 = vmax.f32 %v605_v7, 0.0 }
 0x2f2   : > { %v600_v15 = vadd.f32 %v599_v14, %v536_v9  ;;  %v611_v18 = vmax.f32 %v597_v11, 0.0 }
 0x2f3   : > { %v614_v17 = vmax.f32 %v608_v13, 0.0 }
 0x2f4   : > { %v612_v19 = vmax.f32 %v600_v15, 0.0 }
 0x2f5   : > { %v617_v20 = vpack.c.bf16 %v614_v17, %v613_v16 }
 0x2f6   : > { %v616_v21 = vpack.c.bf16 %v612_v19, %v611_v18 }
 0x2f8   : > { %809 = vmatpush3.bf16.msra.mxu1 %v616_v21 }
 0x2f9   : > { %810 = vmatprep.subr.bf16.mxu1 %v870_v1 }
 0x2fc   : > { %811 = vmatpush3.bf16.msra.mxu1 %v617_v20 }
 0x2ff   : > { %813 = vmatmul.mubr.msk.bf16.vlgmr.msra.gmra.mrb[8].mxu1 %vm464_vm1, %v615_v22 }
 0x3d2   : > { %v660_v24 = vpop.f32.mrb[8].mxu1 }
 0x3d3   : > { %v661_v25 = vadd.f32 %v660_v24, %v621_v23  ;;  %v814_v26 = vpop.f32.mrb[9].mxu1 }
 0x3d4   : > { %v663_v27 = vpop.f32.mrb[10].mxu1 }
 0x3d5   : > { %666 = vst [vmem:[%s251_s9] sm:$0xf] %v661_v25  ;;  %v815_v28 = vpop.f32.mrb[11].mxu1 }
 0x3d6 PF: > { %s16_s21 = sadd.s32 1, %s865_s21  }
 0x3d7   : > { %p13_p5 = scmp.ge.s32.totalorder %s16_s21, 4  }
 0x3d9   :  { %15 = sbr.rel (!%p13_p5) target bundleno = 1 (0x1), region = 74 }

</bundles_post_ra>
